<compile_context>
chip_gen: v7x
topology: tpu7x:2x2x1
jax: 0.10.0
libtpu: 0.0.40
codegen_flags: <defaults>
</compile_context>

<pallas_src>
import math

import jax
import jax.numpy as jnp
from jax import lax
from jax.experimental import pallas as pl
from jax.experimental.pallas import tpu as pltpu


# ------------------------------ model structure ------------------------------

def _make_dilations(layers, blocks):
    dilations = []
    init_dilation = 1
    for _ in range(blocks):
        new_dilation = 1
        for _ in range(layers):
            dilations.append((new_dilation, init_dilation))
            init_dilation = new_dilation
            new_dilation *= 2
    return dilations


def _choose_batch_block(n, seg_len, bytes_per_column,
                        target_lanes=1024, act_budget_bytes=24 << 20):
    """How many batch elements to flatten into the lane axis per grid step.

    Lane density first (a <128-lane slab wastes vreg lanes and forces masked
    ops on every generation); capped so the resident activation slab stays
    well inside VMEM (v7x has 64 MiB physical / 32 MiB scoped default).
    # TODO(synk): on v7x prefer keeping n // n_seg >= 2 so both TensorCores
    # receive grid steps via the "parallel" axis.
    """
    best = 1
    for nb in range(1, n + 1):
        if n % nb:
            continue
        w = nb * seg_len
        if nb > 1 and w > max(target_lanes, seg_len):
            continue
        if nb > 1 and w * bytes_per_column > act_budget_bytes:
            continue
        best = nb
    return best


def _pad_to_lane_multiple(seg_len, n_seg, lane=128):
    """Smallest per-segment left pad so n_seg * (seg_len + pad) % 128 == 0."""
    step = lane // math.gcd(n_seg, lane)
    return (-seg_len) % step


# ------------------------------ fused Pallas kernel ------------------------------

def _make_fused_kernel(dils, per_block_dils, blocks, layers_per_block,
                       R, D, S, n_seg, seg_len, out_len,
                       use_block_loop, gate_dtype):
    """Whole-network kernel for one batch block.

    Layout: channels on sublanes, (time, batch-in-block) interleaved on lanes,
    column = t * n_seg + b, W = n_seg * seg_len.  Streams are end-aligned: the
    first sum(dilations) timesteps of every segment become causally-invalid
    garbage that the output tail never reads.
    """
    W = n_seg * seg_len
    T_out = n_seg * out_len
    n_layers = len(dils)
    cdt = jnp.bfloat16  # MXU operand dtype (f32 accumulation)

    def kernel(inp_ref, w_start_ref, wt0_ref, wt1_ref, wr_ref, ws_ref,
               w_end_ref, b_end_ref, out_ref):
        # inp_ref     : (1, 1, W)  f32    raw audio, time-major lanes
        # w_start_ref : (R, 1)     f32    1x1 start conv (1 -> R), no bias
        # wt0_ref     : (n_layers, 2D, R) bf16   [Wf; Wg] tap applied to x[t-d]
        # wt1_ref     : (n_layers, 2D, R) bf16   [Wf; Wg] tap applied to x[t]
        # wr_ref      : (n_layers, R, D)  bf16   residual 1x1
        # ws_ref      : (n_layers, S, D)  bf16   skip 1x1
        # w_end_ref   : (C, S) bf16,  b_end_ref : (C, 1) f32
        # out_ref     : (1, C, T_out) f32
        x = w_start_ref[...] * inp_ref[0]                  # (R, W) start conv
        skip = jnp.zeros((S, T_out), jnp.float32)

        def layer_step(x, skip, w0, w1, wr, ws, d, compute_residual):
            # Previous-tap via lane roll (XLU, no copy through ld/st slots).
            # Wrapped-in columns only land in the causally-invalid prefix
            # (t < sum(dilations)), which the output tail never reads.
            x_prev = pltpu.roll(x, d * n_seg, axis=1)
            fg = (jnp.dot(w0, x_prev.astype(cdt),
                          preferred_element_type=jnp.float32)
                  + jnp.dot(w1, x.astype(cdt),
                            preferred_element_type=jnp.float32))    # (2D, W)
            # gate_dtype=bfloat16 on v6e/v7x gives ~2x EUP throughput;
            # keep f32 on v5e (no bf16 EUP).
            fg = fg.astype(gate_dtype)
            z = (jnp.tanh(fg[:D, :])
                 * jax.nn.sigmoid(fg[D:, :])).astype(jnp.float32)   # (D, W)
            # Skip conv only on the output tail: in time-major layout the last
            # T_out lanes are exactly the last out_len timesteps of every
            # segment (lane-contiguous).
            skip = skip + jnp.dot(ws, z[:, W - T_out:].astype(cdt),
                                  preferred_element_type=jnp.float32)
            if compute_residual:
                x = x + jnp.dot(wr, z.astype(cdt),
                                preferred_element_type=jnp.float32)
            return x, skip

        if use_block_loop:
            # Deep nets: fori_loop over blocks (same dilation pattern every
            # block) keeps vreg live ranges / compile time bounded; the layers
            # inside a block stay statically unrolled (static roll shifts).
            def block_body(b, carry):
                xb, sb = carry
                for j, d in enumerate(per_block_dils):
                    li = b * layers_per_block + j
                    xb, sb = layer_step(xb, sb, wt0_ref[li], wt1_ref[li],
                                        wr_ref[li], ws_ref[li], d, True)
                return xb, sb
            x, skip = lax.fori_loop(0, blocks, block_body, (x, skip))
        else:
            for i, d in enumerate(dils):
                x, skip = layer_step(x, skip, wt0_ref[i], wt1_ref[i],
                                     wr_ref[i], ws_ref[i], d,
                                     compute_residual=(i < n_layers - 1))

        # relu -> 1x1 end conv (+bias); one lane-dense store of the whole tail.
        y = (jnp.dot(w_end_ref[...], jnp.maximum(skip, 0.0).astype(cdt),
                     preferred_element_type=jnp.float32)
             + b_end_ref[...])                              # (C, T_out)
        out_ref[0] = y

    return kernel


def wavenet_forward(params, inp, layers, blocks, output_length, kernel_size=2,
                    batch_block=None, gate_dtype=jnp.float32):
    """inp: (N, 1, L) float32 -> (N * output_length, classes) float32."""
    if kernel_size != 2:
        raise NotImplementedError("fused kernel hard-codes kernel_size=2")
    N, cin, L = inp.shape
    assert cin == 1
    dil_pairs = _make_dilations(layers, blocks)
    dils = [d for d, _ in dil_pairs]
    per_block_dils = tuple(dils[:layers])          # identical for every block
    n_layers = len(dils)
    R = params["w_start"].shape[0]
    D = params["wf"][0].shape[0]
    S = params["ws"][0].shape[0]
    C = params["w_end"].shape[0]
    # TODO(synk): inputs shorter than receptive_field + output_length would use
    # pytorch-wavenet's zero-padded dilate() path; the fused kernel reproduces
    # the valid region only (which is all forward() returns otherwise).
    if output_length > L - sum(dils):
        raise NotImplementedError(
            "input too short: need output_length <= L - sum(dilations)")

    # Rough live-activation bytes per lane column (f32 x/fg/z + bf16 casts).
    bytes_per_col = 4 * (R + 2 * D + D) + 2 * (2 * R + D)
    n_seg = (batch_block if batch_block is not None
             else _choose_batch_block(N, L, bytes_per_col))
    assert N % n_seg == 0
    n_blocks = N // n_seg
    # Left-zero-pad every segment so the lane extent is a multiple of 128
    # (pad columns only extend the causally-invalid prefix).
    L_pad = L + _pad_to_lane_multiple(L, n_seg)
    W = n_seg * L_pad
    T_out = n_seg * output_length

    # ---- pack weights once (plain XLA); MXU operands in bfloat16 ----
    wt0 = jnp.stack([jnp.concatenate([params["wf"][i][:, :, 0],
                                      params["wg"][i][:, :, 0]], axis=0)
                     for i in range(n_layers)]).astype(jnp.bfloat16)
    wt1 = jnp.stack([jnp.concatenate([params["wf"][i][:, :, 1],
                                      params["wg"][i][:, :, 1]], axis=0)
                     for i in range(n_layers)]).astype(jnp.bfloat16)
    wr_s = jnp.stack([params["wr"][i][:, :, 0]
                      for i in range(n_layers)]).astype(jnp.bfloat16)
    ws_s = jnp.stack([params["ws"][i][:, :, 0]
                      for i in range(n_layers)]).astype(jnp.bfloat16)
    w_start = params["w_start"][:, :, 0]                       # (R, 1) f32
    w_end = params["w_end"][:, :, 0].astype(jnp.bfloat16)      # (C, S)
    b_end = params["b_end"].reshape(C, 1)                      # (C, 1) f32

    # ---- input: left pad, then time-major interleave of the batch block ----
    x_in = jnp.pad(inp[:, 0, :], ((0, 0), (L_pad - L, 0)))     # (N, L_pad)
    x_in = x_in.reshape(n_blocks, n_seg, L_pad)
    x_in = jnp.transpose(x_in, (0, 2, 1)).reshape(n_blocks, 1, W)  # col = t*n_seg+b

    use_block_loop = n_layers > 8 and blocks > 1
    kernel = _make_fused_kernel(tuple(dils), per_block_dils, blocks, layers,
                                R, D, S, n_seg, L_pad, output_length,
                                use_block_loop, gate_dtype)

    flops = n_blocks * (n_layers * (2 * (2 * D) * R * W * 2
                                    + 2 * R * D * W
                                    + 2 * S * D * T_out)
                        + 2 * C * S * T_out)
    transcendentals = n_blocks * n_layers * 2 * D * W
    weight_bytes = (2 * (wt0.size + wt1.size + wr_s.size + ws_s.size
                         + w_end.size)
                    + 4 * (w_start.size + b_end.size))
    bytes_accessed = 4 * x_in.size + weight_bytes + 4 * n_blocks * C * T_out

    act_bytes = W * bytes_per_col + 4 * S * T_out + 4 * (2 * D) * W
    vmem_limit = int(min(100 << 20,
                         max(32 << 20,
                             2 * (act_bytes + 2 * weight_bytes
                                  + 2 * 4 * W + 2 * 4 * C * T_out))))

    # TODO(synk): constant-index weight blocks could be single-buffered via
    # pipeline_mode=pl.Buffered(1) to halve their VMEM footprint on v7x.
    out = pl.pallas_call(
        kernel,
        out_shape=jax.ShapeDtypeStruct((n_blocks, C, T_out), jnp.float32),
        grid=(n_blocks,),
        in_specs=[
            pl.BlockSpec((1, 1, W), lambda i: (i, 0, 0)),
            pl.BlockSpec((R, 1), lambda i: (0, 0)),
            pl.BlockSpec((n_layers, 2 * D, R), lambda i: (0, 0, 0)),
            pl.BlockSpec((n_layers, 2 * D, R), lambda i: (0, 0, 0)),
            pl.BlockSpec((n_layers, R, D), lambda i: (0, 0, 0)),
            pl.BlockSpec((n_layers, S, D), lambda i: (0, 0, 0)),
            pl.BlockSpec((C, S), lambda i: (0, 0)),
            pl.BlockSpec((C, 1), lambda i: (0, 0)),
        ],
        out_specs=pl.BlockSpec((1, C, T_out), lambda i: (i, 0, 0)),
        compiler_params=pltpu.CompilerParams(
            dimension_semantics=("parallel",),
            vmem_limit_bytes=vmem_limit),
        cost_estimate=pl.CostEstimate(flops=int(flops),
                                      transcendentals=int(transcendentals),
                                      bytes_accessed=int(bytes_accessed)),
    )(x_in, w_start, wt0, wt1, wr_s, ws_s, w_end, b_end)

    # (n_blocks, C, out_len*n_seg) time-major -> (N*output_length, C), matching
    # PyTorch forward()'s transpose(1, 2).view(n * l, c).
    out = out.reshape(n_blocks, C, output_length, n_seg)
    return jnp.transpose(out, (0, 3, 2, 1)).reshape(N * output_length, C)


# ------------------- pure-JAX reference (exact PyTorch port) -------------------
# Used only to validate the fused kernel; it replicates the dilate() batch/time
# folding of pytorch-wavenet exactly.

def _dilate_ref(x, dilation, init_dilation=1, pad_start=True):
    n, c, l = x.shape
    dilation_factor = dilation / init_dilation
    if dilation_factor == 1:
        return x
    new_l = int(math.ceil(l / dilation_factor) * dilation_factor)
    if new_l != l:
        pad = new_l - l
        cfg = ((0, 0), (0, 0), (pad, 0)) if pad_start else ((0, 0), (0, 0), (0, pad))
        x = jnp.pad(x, cfg)
        l = new_l
    l_new = int(math.ceil(l * init_dilation / dilation))
    n_new = int(math.ceil(n * dilation / init_dilation))
    x = jnp.transpose(x, (1, 2, 0)).reshape(c, l_new, n_new)
    return jnp.transpose(x, (2, 0, 1))


def wavenet_reference(params, inp, layers, blocks, output_length):
    hp = jax.lax.Precision.HIGHEST
    dil = _make_dilations(layers, blocks)
    w_start = params["w_start"][:, 0, 0]
    x = inp[:, 0:1, :] * w_start[None, :, None]               # (N, R, L)
    skip = None
    for i, (d, init_d) in enumerate(dil):
        residual = _dilate_ref(x, d, init_d)
        wf, wg = params["wf"][i], params["wg"][i]
        xl, xr = residual[:, :, :-1], residual[:, :, 1:]
        f = jnp.tanh(jnp.einsum("dr,nrl->ndl", wf[:, :, 0], xl, precision=hp)
                     + jnp.einsum("dr,nrl->ndl", wf[:, :, 1], xr, precision=hp))
        g = jax.nn.sigmoid(
            jnp.einsum("dr,nrl->ndl", wg[:, :, 0], xl, precision=hp)
            + jnp.einsum("dr,nrl->ndl", wg[:, :, 1], xr, precision=hp))
        z = f * g
        s = z
        if s.shape[2] != 1:
            s = _dilate_ref(z, 1, init_dilation=d)
        s = jnp.einsum("sd,ndl->nsl", params["ws"][i][:, :, 0], s, precision=hp)
        skip = s if skip is None else s + skip[:, :, -s.shape[2]:]
        x = jnp.einsum("rd,ndl->nrl", params["wr"][i][:, :, 0], z,
                       precision=hp) + xr
    out = (jnp.einsum("cs,nsl->ncl", params["w_end"][:, :, 0],
                      jnp.maximum(skip, 0.0), precision=hp)
           + params["b_end"][None, :, None])
    n, c, _ = out.shape
    out = out[:, :, -output_length:]
    return jnp.transpose(out, (0, 2, 1)).reshape(n * output_length, c)


# ------------------------------ parameter init ------------------------------

def init_params(key, layers, blocks, dilation_channels, residual_channels,
                skip_channels, classes, kernel_size=2):
    n_layers = layers * blocks

    def uniform(k, shape, fan_in):
        bound = 1.0 / math.sqrt(fan_in)
        return jax.random.uniform(k, shape, jnp.float32, -bound, bound)

    keys = jax.random.split(key, 3 + n_layers)
    params = {
        "w_start": uniform(keys[0], (residual_channels, 1, 1), 1),
        "wf": [], "wg": [], "wr": [], "ws": [],
        "w_end": uniform(keys[1], (classes, skip_channels, 1), skip_channels),
        "b_end": uniform(keys[2], (classes,), skip_channels),
    }
    for i in range(n_layers):
        k0, k1, k2, k3 = jax.random.split(keys[3 + i], 4)
        params["wf"].append(uniform(
            k0, (dilation_channels, residual_channels, kernel_size),
            residual_channels * kernel_size))
        params["wg"].append(uniform(
            k1, (dilation_channels, residual_channels, kernel_size),
            residual_channels * kernel_size))
        params["wr"].append(uniform(
            k2, (residual_channels, dilation_channels, 1), dilation_channels))
        params["ws"].append(uniform(
            k3, (skip_channels, dilation_channels, 1), dilation_channels))
    return params


# ----------------------------------- main -----------------------------------

if __name__ == "__main__":
    layers = 3
    blocks = 2
    dilation_channels = 8
    residual_channels = 8
    skip_channels = 8
    classes = 16
    output_length = 4
    kernel_size = 2

    key = jax.random.PRNGKey(0)
    k_par, k_in = jax.random.split(key)
    params = init_params(k_par, layers, blocks, dilation_channels,
                         residual_channels, skip_channels, classes, kernel_size)

    batch, length = 2, 32
    inp = jax.random.normal(k_in, (batch, 1, length), jnp.float32)

    out = wavenet_forward(params, inp, layers, blocks, output_length, kernel_size)
    out = jax.block_until_ready(out)
    assert out.shape == (batch * output_length, classes), out.shape
    assert bool(jnp.all(jnp.isfinite(out)))

    # Cross-check the fused Pallas kernel against a pure-JAX port of the exact
    # PyTorch dilate()-folded computation (forward() only returns the last
    # `output_length` steps, which both formulations share).  Tolerance allows
    # for the bf16 MXU operand casts.
    ref = wavenet_reference(params, inp, layers, blocks, output_length)
    max_err = float(jnp.max(jnp.abs(out - ref)))
    assert bool(jnp.allclose(out, ref, rtol=5e-2, atol=7.5e-2)), max_err

    print("KERNEL_OK")
</pallas_src>

<mosaic_0001>
module attributes {stable_mosaic.version = 11 : i64} {
  func.func @kernel(%arg0: i32, %arg1: memref<1x1x128xf32, #tpu.memory_space<vmem>>, %arg2: memref<8x1xf32, #tpu.memory_space<vmem>>, %arg3: memref<6x16x8xbf16, #tpu.memory_space<vmem>>, %arg4: memref<6x16x8xbf16, #tpu.memory_space<vmem>>, %arg5: memref<6x8x8xbf16, #tpu.memory_space<vmem>>, %arg6: memref<6x8x8xbf16, #tpu.memory_space<vmem>>, %arg7: memref<16x8xbf16, #tpu.memory_space<vmem>>, %arg8: memref<16x1xf32, #tpu.memory_space<vmem>>, %arg9: memref<1x16x8xf32, #tpu.memory_space<vmem>>) attributes {dimension_semantics = [#tpu.dimension_semantics<parallel>], iteration_bounds = array<i64: 1>, scalar_prefetch = 0 : i64, scratch_operands = 0 : i64, tpu.core_type = #tpu.core_type<tc>, window_params = [{transform_indices = @transform_0, window_bounds = array<i64: 1, 1, 128>}, {pipeline_mode = #tpu.pipeline_mode<synchronous>, transform_indices = @transform_1, window_bounds = array<i64: 8, 1>}, {pipeline_mode = #tpu.pipeline_mode<synchronous>, transform_indices = @transform_2, window_bounds = array<i64: 6, 16, 8>}, {pipeline_mode = #tpu.pipeline_mode<synchronous>, transform_indices = @transform_3, window_bounds = array<i64: 6, 16, 8>}, {pipeline_mode = #tpu.pipeline_mode<synchronous>, transform_indices = @transform_4, window_bounds = array<i64: 6, 8, 8>}, {pipeline_mode = #tpu.pipeline_mode<synchronous>, transform_indices = @transform_5, window_bounds = array<i64: 6, 8, 8>}, {pipeline_mode = #tpu.pipeline_mode<synchronous>, transform_indices = @transform_6, window_bounds = array<i64: 16, 8>}, {pipeline_mode = #tpu.pipeline_mode<synchronous>, transform_indices = @transform_7, window_bounds = array<i64: 16, 1>}, {transform_indices = @transform_8, window_bounds = array<i64: 1, 16, 8>}]} {
    %c0 = arith.constant 0 : index
    %c0_0 = arith.constant 0 : index
    %0 = vector.load %arg2[%c0, %c0_0] : memref<8x1xf32, #tpu.memory_space<vmem>>, vector<8x1xf32>
    %c0_1 = arith.constant 0 : index
    %c0_2 = arith.constant 0 : index
    %c0_3 = arith.constant 0 : index
    %1 = vector.load %arg1[%c0_1, %c0_2, %c0_3] : memref<1x1x128xf32, #tpu.memory_space<vmem>>, vector<1x1x128xf32>
    %2 = vector.shape_cast %1 : vector<1x1x128xf32> to vector<1x128xf32>
    %3 = vector.broadcast %0 : vector<8x1xf32> to vector<8x128xf32>
    %4 = vector.broadcast %2 : vector<1x128xf32> to vector<8x128xf32>
    %5 = arith.mulf %3, %4 : vector<8x128xf32>
    %cst = arith.constant 0.000000e+00 : f32
    %6 = vector.broadcast %cst : f32 to vector<8x8xf32>
    %c0_4 = arith.constant 0 : index
    %c0_5 = arith.constant 0 : index
    %c0_6 = arith.constant 0 : index
    %7 = vector.load %arg3[%c0_4, %c0_5, %c0_6] : memref<6x16x8xbf16, #tpu.memory_space<vmem>>, vector<1x16x8xbf16>
    %8 = vector.shape_cast %7 : vector<1x16x8xbf16> to vector<16x8xbf16>
    %c0_7 = arith.constant 0 : index
    %c0_8 = arith.constant 0 : index
    %c0_9 = arith.constant 0 : index
    %9 = vector.load %arg4[%c0_7, %c0_8, %c0_9] : memref<6x16x8xbf16, #tpu.memory_space<vmem>>, vector<1x16x8xbf16>
    %10 = vector.shape_cast %9 : vector<1x16x8xbf16> to vector<16x8xbf16>
    %c0_10 = arith.constant 0 : index
    %c0_11 = arith.constant 0 : index
    %c0_12 = arith.constant 0 : index
    %11 = vector.load %arg5[%c0_10, %c0_11, %c0_12] : memref<6x8x8xbf16, #tpu.memory_space<vmem>>, vector<1x8x8xbf16>
    %12 = vector.shape_cast %11 : vector<1x8x8xbf16> to vector<8x8xbf16>
    %c0_13 = arith.constant 0 : index
    %c0_14 = arith.constant 0 : index
    %c0_15 = arith.constant 0 : index
    %13 = vector.load %arg6[%c0_13, %c0_14, %c0_15] : memref<6x8x8xbf16, #tpu.memory_space<vmem>>, vector<1x8x8xbf16>
    %14 = vector.shape_cast %13 : vector<1x8x8xbf16> to vector<8x8xbf16>
    %c2_i32 = arith.constant 2 : i32
    %15 = tpu.dynamic_rotate %5 by %c2_i32 dim 1 : vector<8x128xf32>, i32 -> vector<8x128xf32>
    %16 = arith.truncf %15 : vector<8x128xf32> to vector<8x128xbf16>
    %cst_16 = arith.constant dense<0.000000e+00> : vector<16x128xf32>
    %17 = tpu.matmul %8, %16, %cst_16 {dimension_numbers = #tpu.dot_dimension_numbers<[1], [0], [0], [1], [0, 0, 1, 1], [], []>} : vector<16x8xbf16>, vector<8x128xbf16>, vector<16x128xf32> -> vector<16x128xf32>
    %18 = arith.truncf %5 : vector<8x128xf32> to vector<8x128xbf16>
    %cst_17 = arith.constant dense<0.000000e+00> : vector<16x128xf32>
    %19 = tpu.matmul %10, %18, %cst_17 {dimension_numbers = #tpu.dot_dimension_numbers<[1], [0], [0], [1], [0, 0, 1, 1], [], []>} : vector<16x8xbf16>, vector<8x128xbf16>, vector<16x128xf32> -> vector<16x128xf32>
    %20 = arith.addf %17, %19 : vector<16x128xf32>
    %21 = vector.extract_strided_slice %20 {offsets = [0, 0], sizes = [8, 128], strides = [1, 1]} : vector<16x128xf32> to vector<8x128xf32>
    %22 = math.tanh %21 : vector<8x128xf32>
    %23 = vector.extract_strided_slice %20 {offsets = [8, 0], sizes = [8, 128], strides = [1, 1]} : vector<16x128xf32> to vector<8x128xf32>
    %24 = arith.negf %23 : vector<8x128xf32>
    %25 = math.exp %24 : vector<8x128xf32>
    %cst_18 = arith.constant 1.000000e+00 : f32
    %26 = vector.broadcast %cst_18 : f32 to vector<8x128xf32>
    %27 = arith.addf %26, %25 : vector<8x128xf32>
    %28 = arith.divf %26, %27 : vector<8x128xf32>
    %29 = arith.mulf %22, %28 : vector<8x128xf32>
    %30 = vector.extract_strided_slice %29 {offsets = [0, 120], sizes = [8, 8], strides = [1, 1]} : vector<8x128xf32> to vector<8x8xf32>
    %31 = arith.truncf %30 : vector<8x8xf32> to vector<8x8xbf16>
    %cst_19 = arith.constant dense<0.000000e+00> : vector<8x8xf32>
    %32 = tpu.matmul %14, %31, %cst_19 {dimension_numbers = #tpu.dot_dimension_numbers<[1], [0], [0], [1], [0, 0, 1, 1], [], []>} : vector<8x8xbf16>, vector<8x8xbf16>, vector<8x8xf32> -> vector<8x8xf32>
    %33 = arith.addf %6, %32 : vector<8x8xf32>
    %34 = arith.truncf %29 : vector<8x128xf32> to vector<8x128xbf16>
    %cst_20 = arith.constant dense<0.000000e+00> : vector<8x128xf32>
    %35 = tpu.matmul %12, %34, %cst_20 {dimension_numbers = #tpu.dot_dimension_numbers<[1], [0], [0], [1], [0, 0, 1, 1], [], []>} : vector<8x8xbf16>, vector<8x128xbf16>, vector<8x128xf32> -> vector<8x128xf32>
    %36 = arith.addf %5, %35 : vector<8x128xf32>
    %c1 = arith.constant 1 : index
    %c0_21 = arith.constant 0 : index
    %c0_22 = arith.constant 0 : index
    %37 = vector.load %arg3[%c1, %c0_21, %c0_22] : memref<6x16x8xbf16, #tpu.memory_space<vmem>>, vector<1x16x8xbf16>
    %38 = vector.shape_cast %37 : vector<1x16x8xbf16> to vector<16x8xbf16>
    %c1_23 = arith.constant 1 : index
    %c0_24 = arith.constant 0 : index
    %c0_25 = arith.constant 0 : index
    %39 = vector.load %arg4[%c1_23, %c0_24, %c0_25] : memref<6x16x8xbf16, #tpu.memory_space<vmem>>, vector<1x16x8xbf16>
    %40 = vector.shape_cast %39 : vector<1x16x8xbf16> to vector<16x8xbf16>
    %c1_26 = arith.constant 1 : index
    %c0_27 = arith.constant 0 : index
    %c0_28 = arith.constant 0 : index
    %41 = vector.load %arg5[%c1_26, %c0_27, %c0_28] : memref<6x8x8xbf16, #tpu.memory_space<vmem>>, vector<1x8x8xbf16>
    %42 = vector.shape_cast %41 : vector<1x8x8xbf16> to vector<8x8xbf16>
    %c1_29 = arith.constant 1 : index
    %c0_30 = arith.constant 0 : index
    %c0_31 = arith.constant 0 : index
    %43 = vector.load %arg6[%c1_29, %c0_30, %c0_31] : memref<6x8x8xbf16, #tpu.memory_space<vmem>>, vector<1x8x8xbf16>
    %44 = vector.shape_cast %43 : vector<1x8x8xbf16> to vector<8x8xbf16>
    %c4_i32 = arith.constant 4 : i32
    %45 = tpu.dynamic_rotate %36 by %c4_i32 dim 1 : vector<8x128xf32>, i32 -> vector<8x128xf32>
    %46 = arith.truncf %45 : vector<8x128xf32> to vector<8x128xbf16>
    %cst_32 = arith.constant dense<0.000000e+00> : vector<16x128xf32>
    %47 = tpu.matmul %38, %46, %cst_32 {dimension_numbers = #tpu.dot_dimension_numbers<[1], [0], [0], [1], [0, 0, 1, 1], [], []>} : vector<16x8xbf16>, vector<8x128xbf16>, vector<16x128xf32> -> vector<16x128xf32>
    %48 = arith.truncf %36 : vector<8x128xf32> to vector<8x128xbf16>
    %cst_33 = arith.constant dense<0.000000e+00> : vector<16x128xf32>
    %49 = tpu.matmul %40, %48, %cst_33 {dimension_numbers = #tpu.dot_dimension_numbers<[1], [0], [0], [1], [0, 0, 1, 1], [], []>} : vector<16x8xbf16>, vector<8x128xbf16>, vector<16x128xf32> -> vector<16x128xf32>
    %50 = arith.addf %47, %49 : vector<16x128xf32>
    %51 = vector.extract_strided_slice %50 {offsets = [0, 0], sizes = [8, 128], strides = [1, 1]} : vector<16x128xf32> to vector<8x128xf32>
    %52 = math.tanh %51 : vector<8x128xf32>
    %53 = vector.extract_strided_slice %50 {offsets = [8, 0], sizes = [8, 128], strides = [1, 1]} : vector<16x128xf32> to vector<8x128xf32>
    %54 = arith.negf %53 : vector<8x128xf32>
    %55 = math.exp %54 : vector<8x128xf32>
    %cst_34 = arith.constant 1.000000e+00 : f32
    %56 = vector.broadcast %cst_34 : f32 to vector<8x128xf32>
    %57 = arith.addf %56, %55 : vector<8x128xf32>
    %58 = arith.divf %56, %57 : vector<8x128xf32>
    %59 = arith.mulf %52, %58 : vector<8x128xf32>
    %60 = vector.extract_strided_slice %59 {offsets = [0, 120], sizes = [8, 8], strides = [1, 1]} : vector<8x128xf32> to vector<8x8xf32>
    %61 = arith.truncf %60 : vector<8x8xf32> to vector<8x8xbf16>
    %cst_35 = arith.constant dense<0.000000e+00> : vector<8x8xf32>
    %62 = tpu.matmul %44, %61, %cst_35 {dimension_numbers = #tpu.dot_dimension_numbers<[1], [0], [0], [1], [0, 0, 1, 1], [], []>} : vector<8x8xbf16>, vector<8x8xbf16>, vector<8x8xf32> -> vector<8x8xf32>
    %63 = arith.addf %33, %62 : vector<8x8xf32>
    %64 = arith.truncf %59 : vector<8x128xf32> to vector<8x128xbf16>
    %cst_36 = arith.constant dense<0.000000e+00> : vector<8x128xf32>
    %65 = tpu.matmul %42, %64, %cst_36 {dimension_numbers = #tpu.dot_dimension_numbers<[1], [0], [0], [1], [0, 0, 1, 1], [], []>} : vector<8x8xbf16>, vector<8x128xbf16>, vector<8x128xf32> -> vector<8x128xf32>
    %66 = arith.addf %36, %65 : vector<8x128xf32>
    %c2 = arith.constant 2 : index
    %c0_37 = arith.constant 0 : index
    %c0_38 = arith.constant 0 : index
    %67 = vector.load %arg3[%c2, %c0_37, %c0_38] : memref<6x16x8xbf16, #tpu.memory_space<vmem>>, vector<1x16x8xbf16>
    %68 = vector.shape_cast %67 : vector<1x16x8xbf16> to vector<16x8xbf16>
    %c2_39 = arith.constant 2 : index
    %c0_40 = arith.constant 0 : index
    %c0_41 = arith.constant 0 : index
    %69 = vector.load %arg4[%c2_39, %c0_40, %c0_41] : memref<6x16x8xbf16, #tpu.memory_space<vmem>>, vector<1x16x8xbf16>
    %70 = vector.shape_cast %69 : vector<1x16x8xbf16> to vector<16x8xbf16>
    %c2_42 = arith.constant 2 : index
    %c0_43 = arith.constant 0 : index
    %c0_44 = arith.constant 0 : index
    %71 = vector.load %arg5[%c2_42, %c0_43, %c0_44] : memref<6x8x8xbf16, #tpu.memory_space<vmem>>, vector<1x8x8xbf16>
    %72 = vector.shape_cast %71 : vector<1x8x8xbf16> to vector<8x8xbf16>
    %c2_45 = arith.constant 2 : index
    %c0_46 = arith.constant 0 : index
    %c0_47 = arith.constant 0 : index
    %73 = vector.load %arg6[%c2_45, %c0_46, %c0_47] : memref<6x8x8xbf16, #tpu.memory_space<vmem>>, vector<1x8x8xbf16>
    %74 = vector.shape_cast %73 : vector<1x8x8xbf16> to vector<8x8xbf16>
    %c8_i32 = arith.constant 8 : i32
    %75 = tpu.dynamic_rotate %66 by %c8_i32 dim 1 : vector<8x128xf32>, i32 -> vector<8x128xf32>
    %76 = arith.truncf %75 : vector<8x128xf32> to vector<8x128xbf16>
    %cst_48 = arith.constant dense<0.000000e+00> : vector<16x128xf32>
    %77 = tpu.matmul %68, %76, %cst_48 {dimension_numbers = #tpu.dot_dimension_numbers<[1], [0], [0], [1], [0, 0, 1, 1], [], []>} : vector<16x8xbf16>, vector<8x128xbf16>, vector<16x128xf32> -> vector<16x128xf32>
    %78 = arith.truncf %66 : vector<8x128xf32> to vector<8x128xbf16>
    %cst_49 = arith.constant dense<0.000000e+00> : vector<16x128xf32>
    %79 = tpu.matmul %70, %78, %cst_49 {dimension_numbers = #tpu.dot_dimension_numbers<[1], [0], [0], [1], [0, 0, 1, 1], [], []>} : vector<16x8xbf16>, vector<8x128xbf16>, vector<16x128xf32> -> vector<16x128xf32>
    %80 = arith.addf %77, %79 : vector<16x128xf32>
    %81 = vector.extract_strided_slice %80 {offsets = [0, 0], sizes = [8, 128], strides = [1, 1]} : vector<16x128xf32> to vector<8x128xf32>
    %82 = math.tanh %81 : vector<8x128xf32>
    %83 = vector.extract_strided_slice %80 {offsets = [8, 0], sizes = [8, 128], strides = [1, 1]} : vector<16x128xf32> to vector<8x128xf32>
    %84 = arith.negf %83 : vector<8x128xf32>
    %85 = math.exp %84 : vector<8x128xf32>
    %cst_50 = arith.constant 1.000000e+00 : f32
    %86 = vector.broadcast %cst_50 : f32 to vector<8x128xf32>
    %87 = arith.addf %86, %85 : vector<8x128xf32>
    %88 = arith.divf %86, %87 : vector<8x128xf32>
    %89 = arith.mulf %82, %88 : vector<8x128xf32>
    %90 = vector.extract_strided_slice %89 {offsets = [0, 120], sizes = [8, 8], strides = [1, 1]} : vector<8x128xf32> to vector<8x8xf32>
    %91 = arith.truncf %90 : vector<8x8xf32> to vector<8x8xbf16>
    %cst_51 = arith.constant dense<0.000000e+00> : vector<8x8xf32>
    %92 = tpu.matmul %74, %91, %cst_51 {dimension_numbers = #tpu.dot_dimension_numbers<[1], [0], [0], [1], [0, 0, 1, 1], [], []>} : vector<8x8xbf16>, vector<8x8xbf16>, vector<8x8xf32> -> vector<8x8xf32>
    %93 = arith.addf %63, %92 : vector<8x8xf32>
    %94 = arith.truncf %89 : vector<8x128xf32> to vector<8x128xbf16>
    %cst_52 = arith.constant dense<0.000000e+00> : vector<8x128xf32>
    %95 = tpu.matmul %72, %94, %cst_52 {dimension_numbers = #tpu.dot_dimension_numbers<[1], [0], [0], [1], [0, 0, 1, 1], [], []>} : vector<8x8xbf16>, vector<8x128xbf16>, vector<8x128xf32> -> vector<8x128xf32>
    %96 = arith.addf %66, %95 : vector<8x128xf32>
    %c3 = arith.constant 3 : index
    %c0_53 = arith.constant 0 : index
    %c0_54 = arith.constant 0 : index
    %97 = vector.load %arg3[%c3, %c0_53, %c0_54] : memref<6x16x8xbf16, #tpu.memory_space<vmem>>, vector<1x16x8xbf16>
    %98 = vector.shape_cast %97 : vector<1x16x8xbf16> to vector<16x8xbf16>
    %c3_55 = arith.constant 3 : index
    %c0_56 = arith.constant 0 : index
    %c0_57 = arith.constant 0 : index
    %99 = vector.load %arg4[%c3_55, %c0_56, %c0_57] : memref<6x16x8xbf16, #tpu.memory_space<vmem>>, vector<1x16x8xbf16>
    %100 = vector.shape_cast %99 : vector<1x16x8xbf16> to vector<16x8xbf16>
    %c3_58 = arith.constant 3 : index
    %c0_59 = arith.constant 0 : index
    %c0_60 = arith.constant 0 : index
    %101 = vector.load %arg5[%c3_58, %c0_59, %c0_60] : memref<6x8x8xbf16, #tpu.memory_space<vmem>>, vector<1x8x8xbf16>
    %102 = vector.shape_cast %101 : vector<1x8x8xbf16> to vector<8x8xbf16>
    %c3_61 = arith.constant 3 : index
    %c0_62 = arith.constant 0 : index
    %c0_63 = arith.constant 0 : index
    %103 = vector.load %arg6[%c3_61, %c0_62, %c0_63] : memref<6x8x8xbf16, #tpu.memory_space<vmem>>, vector<1x8x8xbf16>
    %104 = vector.shape_cast %103 : vector<1x8x8xbf16> to vector<8x8xbf16>
    %c2_i32_64 = arith.constant 2 : i32
    %105 = tpu.dynamic_rotate %96 by %c2_i32_64 dim 1 : vector<8x128xf32>, i32 -> vector<8x128xf32>
    %106 = arith.truncf %105 : vector<8x128xf32> to vector<8x128xbf16>
    %cst_65 = arith.constant dense<0.000000e+00> : vector<16x128xf32>
    %107 = tpu.matmul %98, %106, %cst_65 {dimension_numbers = #tpu.dot_dimension_numbers<[1], [0], [0], [1], [0, 0, 1, 1], [], []>} : vector<16x8xbf16>, vector<8x128xbf16>, vector<16x128xf32> -> vector<16x128xf32>
    %108 = arith.truncf %96 : vector<8x128xf32> to vector<8x128xbf16>
    %cst_66 = arith.constant dense<0.000000e+00> : vector<16x128xf32>
    %109 = tpu.matmul %100, %108, %cst_66 {dimension_numbers = #tpu.dot_dimension_numbers<[1], [0], [0], [1], [0, 0, 1, 1], [], []>} : vector<16x8xbf16>, vector<8x128xbf16>, vector<16x128xf32> -> vector<16x128xf32>
    %110 = arith.addf %107, %109 : vector<16x128xf32>
    %111 = vector.extract_strided_slice %110 {offsets = [0, 0], sizes = [8, 128], strides = [1, 1]} : vector<16x128xf32> to vector<8x128xf32>
    %112 = math.tanh %111 : vector<8x128xf32>
    %113 = vector.extract_strided_slice %110 {offsets = [8, 0], sizes = [8, 128], strides = [1, 1]} : vector<16x128xf32> to vector<8x128xf32>
    %114 = arith.negf %113 : vector<8x128xf32>
    %115 = math.exp %114 : vector<8x128xf32>
    %cst_67 = arith.constant 1.000000e+00 : f32
    %116 = vector.broadcast %cst_67 : f32 to vector<8x128xf32>
    %117 = arith.addf %116, %115 : vector<8x128xf32>
    %118 = arith.divf %116, %117 : vector<8x128xf32>
    %119 = arith.mulf %112, %118 : vector<8x128xf32>
    %120 = vector.extract_strided_slice %119 {offsets = [0, 120], sizes = [8, 8], strides = [1, 1]} : vector<8x128xf32> to vector<8x8xf32>
    %121 = arith.truncf %120 : vector<8x8xf32> to vector<8x8xbf16>
    %cst_68 = arith.constant dense<0.000000e+00> : vector<8x8xf32>
    %122 = tpu.matmul %104, %121, %cst_68 {dimension_numbers = #tpu.dot_dimension_numbers<[1], [0], [0], [1], [0, 0, 1, 1], [], []>} : vector<8x8xbf16>, vector<8x8xbf16>, vector<8x8xf32> -> vector<8x8xf32>
    %123 = arith.addf %93, %122 : vector<8x8xf32>
    %124 = arith.truncf %119 : vector<8x128xf32> to vector<8x128xbf16>
    %cst_69 = arith.constant dense<0.000000e+00> : vector<8x128xf32>
    %125 = tpu.matmul %102, %124, %cst_69 {dimension_numbers = #tpu.dot_dimension_numbers<[1], [0], [0], [1], [0, 0, 1, 1], [], []>} : vector<8x8xbf16>, vector<8x128xbf16>, vector<8x128xf32> -> vector<8x128xf32>
    %126 = arith.addf %96, %125 : vector<8x128xf32>
    %c4 = arith.constant 4 : index
    %c0_70 = arith.constant 0 : index
    %c0_71 = arith.constant 0 : index
    %127 = vector.load %arg3[%c4, %c0_70, %c0_71] : memref<6x16x8xbf16, #tpu.memory_space<vmem>>, vector<1x16x8xbf16>
    %128 = vector.shape_cast %127 : vector<1x16x8xbf16> to vector<16x8xbf16>
    %c4_72 = arith.constant 4 : index
    %c0_73 = arith.constant 0 : index
    %c0_74 = arith.constant 0 : index
    %129 = vector.load %arg4[%c4_72, %c0_73, %c0_74] : memref<6x16x8xbf16, #tpu.memory_space<vmem>>, vector<1x16x8xbf16>
    %130 = vector.shape_cast %129 : vector<1x16x8xbf16> to vector<16x8xbf16>
    %c4_75 = arith.constant 4 : index
    %c0_76 = arith.constant 0 : index
    %c0_77 = arith.constant 0 : index
    %131 = vector.load %arg5[%c4_75, %c0_76, %c0_77] : memref<6x8x8xbf16, #tpu.memory_space<vmem>>, vector<1x8x8xbf16>
    %132 = vector.shape_cast %131 : vector<1x8x8xbf16> to vector<8x8xbf16>
    %c4_78 = arith.constant 4 : index
    %c0_79 = arith.constant 0 : index
    %c0_80 = arith.constant 0 : index
    %133 = vector.load %arg6[%c4_78, %c0_79, %c0_80] : memref<6x8x8xbf16, #tpu.memory_space<vmem>>, vector<1x8x8xbf16>
    %134 = vector.shape_cast %133 : vector<1x8x8xbf16> to vector<8x8xbf16>
    %c4_i32_81 = arith.constant 4 : i32
    %135 = tpu.dynamic_rotate %126 by %c4_i32_81 dim 1 : vector<8x128xf32>, i32 -> vector<8x128xf32>
    %136 = arith.truncf %135 : vector<8x128xf32> to vector<8x128xbf16>
    %cst_82 = arith.constant dense<0.000000e+00> : vector<16x128xf32>
    %137 = tpu.matmul %128, %136, %cst_82 {dimension_numbers = #tpu.dot_dimension_numbers<[1], [0], [0], [1], [0, 0, 1, 1], [], []>} : vector<16x8xbf16>, vector<8x128xbf16>, vector<16x128xf32> -> vector<16x128xf32>
    %138 = arith.truncf %126 : vector<8x128xf32> to vector<8x128xbf16>
    %cst_83 = arith.constant dense<0.000000e+00> : vector<16x128xf32>
    %139 = tpu.matmul %130, %138, %cst_83 {dimension_numbers = #tpu.dot_dimension_numbers<[1], [0], [0], [1], [0, 0, 1, 1], [], []>} : vector<16x8xbf16>, vector<8x128xbf16>, vector<16x128xf32> -> vector<16x128xf32>
    %140 = arith.addf %137, %139 : vector<16x128xf32>
    %141 = vector.extract_strided_slice %140 {offsets = [0, 0], sizes = [8, 128], strides = [1, 1]} : vector<16x128xf32> to vector<8x128xf32>
    %142 = math.tanh %141 : vector<8x128xf32>
    %143 = vector.extract_strided_slice %140 {offsets = [8, 0], sizes = [8, 128], strides = [1, 1]} : vector<16x128xf32> to vector<8x128xf32>
    %144 = arith.negf %143 : vector<8x128xf32>
    %145 = math.exp %144 : vector<8x128xf32>
    %cst_84 = arith.constant 1.000000e+00 : f32
    %146 = vector.broadcast %cst_84 : f32 to vector<8x128xf32>
    %147 = arith.addf %146, %145 : vector<8x128xf32>
    %148 = arith.divf %146, %147 : vector<8x128xf32>
    %149 = arith.mulf %142, %148 : vector<8x128xf32>
    %150 = vector.extract_strided_slice %149 {offsets = [0, 120], sizes = [8, 8], strides = [1, 1]} : vector<8x128xf32> to vector<8x8xf32>
    %151 = arith.truncf %150 : vector<8x8xf32> to vector<8x8xbf16>
    %cst_85 = arith.constant dense<0.000000e+00> : vector<8x8xf32>
    %152 = tpu.matmul %134, %151, %cst_85 {dimension_numbers = #tpu.dot_dimension_numbers<[1], [0], [0], [1], [0, 0, 1, 1], [], []>} : vector<8x8xbf16>, vector<8x8xbf16>, vector<8x8xf32> -> vector<8x8xf32>
    %153 = arith.addf %123, %152 : vector<8x8xf32>
    %154 = arith.truncf %149 : vector<8x128xf32> to vector<8x128xbf16>
    %cst_86 = arith.constant dense<0.000000e+00> : vector<8x128xf32>
    %155 = tpu.matmul %132, %154, %cst_86 {dimension_numbers = #tpu.dot_dimension_numbers<[1], [0], [0], [1], [0, 0, 1, 1], [], []>} : vector<8x8xbf16>, vector<8x128xbf16>, vector<8x128xf32> -> vector<8x128xf32>
    %156 = arith.addf %126, %155 : vector<8x128xf32>
    %c5 = arith.constant 5 : index
    %c0_87 = arith.constant 0 : index
    %c0_88 = arith.constant 0 : index
    %157 = vector.load %arg3[%c5, %c0_87, %c0_88] : memref<6x16x8xbf16, #tpu.memory_space<vmem>>, vector<1x16x8xbf16>
    %158 = vector.shape_cast %157 : vector<1x16x8xbf16> to vector<16x8xbf16>
    %c5_89 = arith.constant 5 : index
    %c0_90 = arith.constant 0 : index
    %c0_91 = arith.constant 0 : index
    %159 = vector.load %arg4[%c5_89, %c0_90, %c0_91] : memref<6x16x8xbf16, #tpu.memory_space<vmem>>, vector<1x16x8xbf16>
    %160 = vector.shape_cast %159 : vector<1x16x8xbf16> to vector<16x8xbf16>
    %c5_92 = arith.constant 5 : index
    %c0_93 = arith.constant 0 : index
    %c0_94 = arith.constant 0 : index
    %161 = vector.load %arg6[%c5_92, %c0_93, %c0_94] : memref<6x8x8xbf16, #tpu.memory_space<vmem>>, vector<1x8x8xbf16>
    %162 = vector.shape_cast %161 : vector<1x8x8xbf16> to vector<8x8xbf16>
    %c8_i32_95 = arith.constant 8 : i32
    %163 = tpu.dynamic_rotate %156 by %c8_i32_95 dim 1 : vector<8x128xf32>, i32 -> vector<8x128xf32>
    %164 = arith.truncf %163 : vector<8x128xf32> to vector<8x128xbf16>
    %cst_96 = arith.constant dense<0.000000e+00> : vector<16x128xf32>
    %165 = tpu.matmul %158, %164, %cst_96 {dimension_numbers = #tpu.dot_dimension_numbers<[1], [0], [0], [1], [0, 0, 1, 1], [], []>} : vector<16x8xbf16>, vector<8x128xbf16>, vector<16x128xf32> -> vector<16x128xf32>
    %166 = arith.truncf %156 : vector<8x128xf32> to vector<8x128xbf16>
    %cst_97 = arith.constant dense<0.000000e+00> : vector<16x128xf32>
    %167 = tpu.matmul %160, %166, %cst_97 {dimension_numbers = #tpu.dot_dimension_numbers<[1], [0], [0], [1], [0, 0, 1, 1], [], []>} : vector<16x8xbf16>, vector<8x128xbf16>, vector<16x128xf32> -> vector<16x128xf32>
    %168 = arith.addf %165, %167 : vector<16x128xf32>
    %169 = vector.extract_strided_slice %168 {offsets = [0, 0], sizes = [8, 128], strides = [1, 1]} : vector<16x128xf32> to vector<8x128xf32>
    %170 = math.tanh %169 : vector<8x128xf32>
    %171 = vector.extract_strided_slice %168 {offsets = [8, 0], sizes = [8, 128], strides = [1, 1]} : vector<16x128xf32> to vector<8x128xf32>
    %172 = arith.negf %171 : vector<8x128xf32>
    %173 = math.exp %172 : vector<8x128xf32>
    %cst_98 = arith.constant 1.000000e+00 : f32
    %174 = vector.broadcast %cst_98 : f32 to vector<8x128xf32>
    %175 = arith.addf %174, %173 : vector<8x128xf32>
    %176 = arith.divf %174, %175 : vector<8x128xf32>
    %177 = arith.mulf %170, %176 : vector<8x128xf32>
    %178 = vector.extract_strided_slice %177 {offsets = [0, 120], sizes = [8, 8], strides = [1, 1]} : vector<8x128xf32> to vector<8x8xf32>
    %179 = arith.truncf %178 : vector<8x8xf32> to vector<8x8xbf16>
    %cst_99 = arith.constant dense<0.000000e+00> : vector<8x8xf32>
    %180 = tpu.matmul %162, %179, %cst_99 {dimension_numbers = #tpu.dot_dimension_numbers<[1], [0], [0], [1], [0, 0, 1, 1], [], []>} : vector<8x8xbf16>, vector<8x8xbf16>, vector<8x8xf32> -> vector<8x8xf32>
    %181 = arith.addf %153, %180 : vector<8x8xf32>
    %c0_100 = arith.constant 0 : index
    %c0_101 = arith.constant 0 : index
    %182 = vector.load %arg7[%c0_100, %c0_101] : memref<16x8xbf16, #tpu.memory_space<vmem>>, vector<16x8xbf16>
    %cst_102 = arith.constant 0.000000e+00 : f32
    %183 = vector.broadcast %cst_102 : f32 to vector<8x8xf32>
    %184 = arith.maximumf %181, %183 : vector<8x8xf32>
    %185 = arith.truncf %184 : vector<8x8xf32> to vector<8x8xbf16>
    %cst_103 = arith.constant dense<0.000000e+00> : vector<16x8xf32>
    %186 = tpu.matmul %182, %185, %cst_103 {dimension_numbers = #tpu.dot_dimension_numbers<[1], [0], [0], [1], [0, 0, 1, 1], [], []>} : vector<16x8xbf16>, vector<8x8xbf16>, vector<16x8xf32> -> vector<16x8xf32>
    %c0_104 = arith.constant 0 : index
    %c0_105 = arith.constant 0 : index
    %187 = vector.load %arg8[%c0_104, %c0_105] : memref<16x1xf32, #tpu.memory_space<vmem>>, vector<16x1xf32>
    %188 = vector.broadcast %187 : vector<16x1xf32> to vector<16x8xf32>
    %189 = arith.addf %186, %188 : vector<16x8xf32>
    %c0_106 = arith.constant 0 : index
    %c0_107 = arith.constant 0 : index
    %c0_108 = arith.constant 0 : index
    %190 = vector.load %arg9[%c0_106, %c0_107, %c0_108] : memref<1x16x8xf32, #tpu.memory_space<vmem>>, vector<1x16x8xf32>
    %191 = vector.shape_cast %190 : vector<1x16x8xf32> to vector<16x8xf32>
    %192 = vector.shape_cast %189 : vector<16x8xf32> to vector<1x16x8xf32>
    tpu.vector_store %arg9[%c0_106, %c0_107, %c0_108], %192 {strides = array<i32>} : memref<1x16x8xf32, #tpu.memory_space<vmem>>, vector<1x16x8xf32>,
    return
  }
  func.func @transform_0(%arg0: i32) -> (i32, i32, i32) {
    %c0_i32 = arith.constant 0 : i32
    %c0_i32_0 = arith.constant 0 : i32
    %c0_i32_1 = arith.constant 0 : i32
    return %arg0, %c0_i32, %c0_i32_0 : i32, i32, i32
  }
  func.func @transform_1(%arg0: i32) -> (i32, i32) {
    %c0_i32 = arith.constant 0 : i32
    %c0_i32_0 = arith.constant 0 : i32
    %c0_i32_1 = arith.constant 0 : i32
    return %c0_i32, %c0_i32_0 : i32, i32
  }
  func.func @transform_2(%arg0: i32) -> (i32, i32, i32) {
    %c0_i32 = arith.constant 0 : i32
    %c0_i32_0 = arith.constant 0 : i32
    %c0_i32_1 = arith.constant 0 : i32
    %c0_i32_2 = arith.constant 0 : i32
    return %c0_i32, %c0_i32_0, %c0_i32_1 : i32, i32, i32
  }
  func.func @transform_3(%arg0: i32) -> (i32, i32, i32) {
    %c0_i32 = arith.constant 0 : i32
    %c0_i32_0 = arith.constant 0 : i32
    %c0_i32_1 = arith.constant 0 : i32
    %c0_i32_2 = arith.constant 0 : i32
    return %c0_i32, %c0_i32_0, %c0_i32_1 : i32, i32, i32
  }
  func.func @transform_4(%arg0: i32) -> (i32, i32, i32) {
    %c0_i32 = arith.constant 0 : i32
    %c0_i32_0 = arith.constant 0 : i32
    %c0_i32_1 = arith.constant 0 : i32
    %c0_i32_2 = arith.constant 0 : i32
    return %c0_i32, %c0_i32_0, %c0_i32_1 : i32, i32, i32
  }
  func.func @transform_5(%arg0: i32) -> (i32, i32, i32) {
    %c0_i32 = arith.constant 0 : i32
    %c0_i32_0 = arith.constant 0 : i32
    %c0_i32_1 = arith.constant 0 : i32
    %c0_i32_2 = arith.constant 0 : i32
    return %c0_i32, %c0_i32_0, %c0_i32_1 : i32, i32, i32
  }
  func.func @transform_6(%arg0: i32) -> (i32, i32) {
    %c0_i32 = arith.constant 0 : i32
    %c0_i32_0 = arith.constant 0 : i32
    %c0_i32_1 = arith.constant 0 : i32
    return %c0_i32, %c0_i32_0 : i32, i32
  }
  func.func @transform_7(%arg0: i32) -> (i32, i32) {
    %c0_i32 = arith.constant 0 : i32
    %c0_i32_0 = arith.constant 0 : i32
    %c0_i32_1 = arith.constant 0 : i32
    return %c0_i32, %c0_i32_0 : i32, i32
  }
  func.func @transform_8(%arg0: i32) -> (i32, i32, i32) {
    %c0_i32 = arith.constant 0 : i32
    %c0_i32_0 = arith.constant 0 : i32
    %c0_i32_1 = arith.constant 0 : i32
    return %arg0, %c0_i32, %c0_i32_0 : i32, i32, i32
  }
}

</mosaic_0001>

<bundles_post_ra>
// kernel: tpu_custom_call.1
= control target key start
LH: loop header
LB: loop body
LE: loop exit
PB: predicated region body
PF: predicated region fallthrough
CT: control target
= control target key end

     0   :  { %v1775_v0 = vmov 0   ;;  %v1776_v2 = vmov 0.0   ;;  %vm1777_vm0 = vmmov 0   ;;  %vm63_vm1 = vcmask 1043456   ;;  %s1779_s12 = smov 8   ;;  %s1780_s15 = smov 4   ;;  %s2050_s1 = inlined_call_operand.vmem [shape: f32[8,1], index: 1, kind: input, shape index: {}]   ;;  %s2051_s3 = inlined_call_operand.vmem [shape: bf16[6,16,8], index: 3, kind: input, shape index: {}]   ;;  %s2052_s2 = inlined_call_operand.vmem [shape: bf16[6,16,8], index: 2, kind: input, shape index: {}]   ;;  %s2053_s0 = inlined_call_operand.vmem [shape: f32[1,1,128], index: 0, kind: input, shape index: {}]   ;;  %s2054_s4 = inlined_call_operand.vmem [shape: bf16[6,8,8], index: 4, kind: input, shape index: {}]   ;;  %s2055_s5 = inlined_call_operand.vmem [shape: bf16[6,8,8], index: 5, kind: input, shape index: {}]   ;;  %s2056_s7 = inlined_call_operand.vmem [shape: f32[16,1], index: 7, kind: input, shape index: {}]   ;;  %s2057_s6 = inlined_call_operand.vmem [shape: bf16[16,8], index: 6, kind: input, shape index: {}]   ;;  %s2058_s8 = inlined_call_operand.vmem [shape: f32[1,16,8], index: 8, kind: output, shape index: {}]  }
   0x1   :  { %1724 = vset.pattern.permute.xlu0 %v1775_v0  ;;  %v30_v1 = vld [vmem:[%s2050_s1] sm:$0xff]  ;;  %1725 = vset.pattern.permute.xlu1 %v1775_v0  ;;  %s1778_s1 = smov 2   ;;  %vm59_vm2 = vcmask 64512   ;;  %v1728_v33 = vld [vmem:[%s2051_s3 + $0x8] sm:$0xff]   ;;  %v1730_v0 = vld [vmem:[%s2051_s3 + $0x10] sm:$0xff]  }
   0x2   :  { %34 = vperm.xlu0 %1724, %v30_v1   ;;  %1530 = vmatprep.subr.bf16.mxu0 %v1776_v2  ;;  %v1409_v3 = vld [vmem:[%s2053_s0] ss:$0 sm:$0xff]  ;;  %v1729_v37 = vld [vmem:[%s2052_s2 + $0x8] sm:$0xff]   ;;  %v1420_v50 = vld [vmem:[%s2054_s4 + $0x4] sm:$0xf] }
   0x3   :  { %1542 = vmatprep.subr.bf16.mxu1 %v1776_v2  ;;  %1532 = vmatprep.mubr.msk.bf16.mxu0 %vm1777_vm0, %v1776_v2  ;;  %v1726_v8 = vld [vmem:[%s2051_s3] sm:$0xff]  }
   0x4   :  { %1544 = vmatprep.mubr.msk.bf16.mxu1 %vm1777_vm0, %v1776_v2  ;;  %v1727_v12 = vld [vmem:[%s2052_s2] sm:$0xff]  }
   0x5   :  { %v48_v25 = vld [vmem:[%s2054_s4] sm:$0xf]  ;;  %v1421_v54 = vld [vmem:[%s2055_s5 + $0x4] sm:$0xf] }
   0x6   :  { %v49_v56 = vld [vmem:[%s2055_s5] sm:$0xf] }
  0x81   :  { %v35_v4 = vpop.permute.xlu0 %34 }
  0x82   :  { %v43_v5 = vmul.f32 %v1409_v3, %v35_v4 }
  0x84   :  { %50 = vrot.lane.b32.xlu0 %v43_v5, %s1778_s1  ;;  %v53_v6 = vpack.c.bf16 %v43_v5, %v43_v5 }
  0x86   :  { %v65_v7 = vsel %vm63_vm1, %v53_v6, 0 }
  0x87   :  { %1531 = vmatpush3.bf16.msra.mxu0 %v65_v7 }
  0x88   :  { %1536 = vmatprep.subr.bf16.mxu0 %v1776_v2 }
  0x8a   :  { %1533 = vmatmul.mubr.msk.bf16.vlgmr.msra.gmra.mrb[0].mxu0 %vm59_vm2, %v1726_v8 }
  0x8b   :  { %1538 = vmatprep.mubr.msk.bf16.mxu0 %vm1777_vm0, %v1776_v2 }
  0xf6   :  { %v51_v9 = vpop.permute.xlu0 %50 }
  0xf7   :  { %v52_v10 = vpack.c.bf16 %v51_v9, %v51_v9 }
  0xf9   :  { %v117_v11 = vsel %vm63_vm1, %v52_v10, 0 }
  0xfa   :  { %1537 = vmatpush3.bf16.msra.mxu0 %v117_v11 }
  0xfb   :  { %1560 = vmatprep.subr.bf16.mxu0 %v1776_v2 }
  0xfd   :  { %1539 = vmatmul.mubr.msk.bf16.vlgmr.msra.gmra.mrb[0].mxu0 %vm59_vm2, %v1727_v12 }
  0xfe   :  { %1562 = vmatprep.mubr.msk.bf16.mxu0 %vm1777_vm0, %v1776_v2 }
 0x1d0   :  { %v153_v13 = vpop.f32.mrb[0].mxu0 }
 0x1d1   :  { %v1540_v14 = vpop.f32.mrb[1].mxu0 }
 0x1d2   :  { %v156_v15 = vpop.f32.mrb[2].mxu0 }
 0x1d3   :  { %v1414_v16 = vmul.f32 -1.442695, %v156_v15  ;;  %v1541_v17 = vpop.f32.mrb[3].mxu0 }
 0x1d5   :  { %1739 = vpow2.f32 %v1414_v16 }
 0x1d6   :  { %1741 = vtanh.f32 %v153_v13 }
 0x1df   :  { %v1740_v18 = vpop.eup %1739 }
 0x1e0   :  { %v164_v19 = vadd.f32 1.0, %v1740_v18  ;;  %v1742_v20 = vpop.eup %1741  ;;  %v1434_v18 = vld [vmem:[%s2054_s4 + $0x8] sm:$0xf] }
 0x1e2   :  { %1743 = vrcp.f32 %v164_v19 }
 0x1ec   :  { %v1744_v21 = vpop.eup %1743 }
 0x1ed   :  { %v167_v22 = vmul.f32 %v1744_v21, %v1742_v20 }
 0x1ef   :  { %v168_v23 = vpack.c.bf16 %v167_v22, %v167_v22 }
 0x1f1   :  { %393 = vrot.lane.b32.xlu0 %v168_v23, %s1779_s12  ;;  %v173_v24 = vsel %vm63_vm1, %v168_v23, 0 }
 0x1f2   :  { %1543 = vmatpush3.bf16.msra.mxu1 %v173_v24 }
 0x1f3   :  { %1548 = vmatprep.subr.bf16.mxu1 %v1776_v2 }
 0x1f5   :  { %1545 = vmatmul.mubr.msk.bf16.vlgmr.msra.gmra.mrb[0].mxu1 %vm59_vm2, %v48_v25 }
 0x1f6   :  { %1550 = vmatprep.mubr.msk.bf16.mxu1 %vm1777_vm0, %v1776_v2 }
 0x263   :  { %v394_v53 = vpop.permute.xlu0 %393 }
 0x264   :  { %v399_v55 = vsel %vm63_vm1, %v394_v53, 0 }
 0x2c8   :  { %v209_v26 = vpop.f32.mrb[0].mxu1 }
 0x2c9   :  { %v215_v27 = vadd.f32 %v209_v26, %v43_v5  ;;  %v1546_v28 = vpop.f32.mrb[1].mxu1  ;;  %v1731_v5 = vld [vmem:[%s2052_s2 + $0x10] sm:$0xff]  }
 0x2ca   :  { %v212_v29 = vpop.f32.mrb[2].mxu1  ;;  %v1732_v28 = vld [vmem:[%s2051_s3 + $0x18] sm:$0xff]  }
 0x2cb   :  { %v229_v30 = vpack.c.bf16 %v215_v27, %v215_v27  ;;  %226 = vrot.lane.b32.xlu1 %v215_v27, %s1780_s15  ;;  %v1547_v31 = vpop.f32.mrb[3].mxu1 }
 0x2cd   :  { %v239_v32 = vsel %vm63_vm1, %v229_v30, 0 }
 0x2ce   :  { %1549 = vmatpush3.bf16.msra.mxu1 %v239_v32  ;;  %v1733_v32 = vld [vmem:[%s2052_s2 + $0x18] sm:$0xff]  }
 0x2cf   :  { %1554 = vmatprep.subr.bf16.mxu1 %v1776_v2 }
 0x2d1   :  { %1551 = vmatmul.mubr.msk.bf16.vlgmr.msra.gmra.mrb[4].mxu1 %vm59_vm2, %v1728_v33 }
 0x2d2   :  { %1556 = vmatprep.mubr.msk.bf16.mxu1 %vm1777_vm0, %v1776_v2 }
 0x33d   :  { %v227_v34 = vpop.permute.xlu1 %226 }
 0x33e   :  { %v228_v35 = vpack.c.bf16 %v227_v34, %v227_v34 }
 0x340   :  { %v291_v36 = vsel %vm63_vm1, %v228_v35, 0 }
 0x341   :  { %1555 = vmatpush3.bf16.msra.mxu1 %v291_v36 }
 0x342   :  { %1572 = vmatprep.subr.bf16.mxu1 %v1776_v2 }
 0x344   :  { %1557 = vmatmul.mubr.msk.bf16.vlgmr.msra.gmra.mrb[4].mxu1 %vm59_vm2, %v1729_v37 }
 0x345   :  { %1574 = vmatprep.mubr.msk.bf16.mxu1 %vm1777_vm0, %v1776_v2 }
 0x417   :  { %v327_v38 = vpop.f32.mrb[4].mxu1 }
 0x418   :  { %v1558_v39 = vpop.f32.mrb[5].mxu1 }
 0x419   :  { %v330_v40 = vpop.f32.mrb[6].mxu1 }
 0x41a   :  { %v1426_v41 = vmul.f32 -1.442695, %v330_v40  ;;  %v1559_v42 = vpop.f32.mrb[7].mxu1  ;;  %v1435_v40 = vld [vmem:[%s2055_s5 + $0x8] sm:$0xf] }
 0x41c   :  { %1745 = vpow2.f32 %v1426_v41 }
 0x41d   :  { %1747 = vtanh.f32 %v327_v38 }
 0x426   :  { %v1746_v43 = vpop.eup %1745 }
 0x427   :  { %v338_v44 = vadd.f32 1.0, %v1746_v43  ;;  %v1748_v45 = vpop.eup %1747 }
 0x429   :  { %1749 = vrcp.f32 %v338_v44 }
 0x433   :  { %v1750_v46 = vpop.eup %1749 }
 0x434   :  { %v341_v47 = vmul.f32 %v1750_v46, %v1748_v45  ;;  %v1447_v46 = vld [vmem:[%s2054_s4 + $0xc] sm:$0xf] }
 0x436   :  { %v342_v48 = vpack.c.bf16 %v341_v47, %v341_v47 }
 0x438   :  { %344 = vrot.lane.b32.xlu1 %v342_v48, %s1779_s12  ;;  %v445_v49 = vsel %vm63_vm1, %v342_v48, 0 }
 0x439   :  { %1573 = vmatpush3.bf16.msra.mxu1 %v445_v49  ;;  %v1448_v49 = vld [vmem:[%s2055_s5 + $0xc] sm:$0xf] }
 0x43a   :  { %1596 = vmatprep.subr.bf16.mxu1 %v1776_v2 }
 0x43c   :  { %1575 = vmatmul.mubr.msk.bf16.vlgmr.msra.gmra.mrb[8].mxu1 %vm59_vm2, %v1420_v50 }
 0x43d   :  { %1598 = vmatprep.mubr.msk.bf16.mxu1 %vm1777_vm0, %v1776_v2 }
 0x4aa   :  { %v345_v51 = vpop.permute.xlu1 %344 }
 0x4ab   :  { %v350_v52 = vsel %vm63_vm1, %v345_v51, 0 }
 0x4ac   :  { %1561 = vmatpush3.bf16.msra.mxu0 %v350_v52 }
 0x4ad   :  { %1566 = vmatprep.subr.bf16.mxu0 %v1776_v2 }
 0x4af   :  { %1563 = vmatmul.mubr.msk.bf16.vlgmr.msra.gmra.mrb[4].mxu0 %vm59_vm2, %v1421_v54 }
 0x4b0   :  { %1567 = vmatpush3.bf16.msra.mxu0 %v399_v55  ;;  %1568 = vmatprep.mubr.msk.bf16.mxu0 %vm1777_vm0, %v1776_v2 }
 0x4b1   :  { %1578 = vmatprep.subr.bf16.mxu0 %v1776_v2 }
 0x4bb   :  { %1569 = vmatmul.mubr.msk.bf16.vlgmr.msra.gmra.mrb[4].mxu0 %vm59_vm2, %v49_v56 }
 0x4bc   :  { %1580 = vmatprep.mubr.msk.bf16.mxu0 %vm1777_vm0, %v1776_v2 }
 0x50f   :  { %v481_v57 = vpop.f32.mrb[8].mxu1 }
 0x510   :  { %v487_v58 = vadd.f32 %v481_v57, %v215_v27  ;;  %v1576_v59 = vpop.f32.mrb[9].mxu1  ;;  %v1734_v57 = vld [vmem:[%s2051_s3 + $0x20] sm:$0xff]  }
 0x511   :  { %v484_v60 = vpop.f32.mrb[10].mxu1 }
 0x512   :  { %v501_v61 = vpack.c.bf16 %v487_v58, %v487_v58  ;;  %498 = vrot.lane.b32.xlu1 %v487_v58, %s1779_s12  ;;  %v1577_v62 = vpop.f32.mrb[11].mxu1 }
 0x514   :  { %v511_v63 = vsel %vm63_vm1, %v501_v61, 0  ;;  %v1735_v61 = vld [vmem:[%s2052_s2 + $0x20] sm:$0xff]  }
 0x515   :  { %1579 = vmatpush3.bf16.msra.mxu0 %v511_v63 }
 0x516   :  { %1584 = vmatprep.subr.bf16.mxu0 %v1776_v2 }
 0x518   :  { %1581 = vmatmul.mubr.msk.bf16.vlgmr.msra.gmra.mrb[8].mxu0 %vm59_vm2, %v1730_v0 }
 0x519   :  { %1586 = vmatprep.mubr.msk.bf16.mxu0 %vm1777_vm0, %v1776_v2 }
 0x584   :  { %v499_v1 = vpop.permute.xlu1 %498 }
 0x585   :  { %v500_v3 = vpack.c.bf16 %v499_v1, %v499_v1 }
 0x587   :  { %v563_v4 = vsel %vm63_vm1, %v500_v3, 0 }
 0x588   :  { %1585 = vmatpush3.bf16.msra.mxu0 %v563_v4 }
 0x589   :  { %1590 = vmatprep.subr.bf16.mxu0 %v1776_v2 }
 0x58b   :  { %1587 = vmatmul.mubr.msk.bf16.vlgmr.msra.gmra.mrb[8].mxu0 %vm59_vm2, %v1731_v5 }
 0x58c   :  { %1592 = vmatprep.mubr.msk.bf16.mxu0 %vm1777_vm0, %v1776_v2 }
 0x65e   :  { %v599_v6 = vpop.f32.mrb[8].mxu0 }
 0x65f   :  { %v1588_v7 = vpop.f32.mrb[9].mxu0 }
 0x660   :  { %v602_v8 = vpop.f32.mrb[10].mxu0 }
 0x661   :  { %v1440_v9 = vmul.f32 -1.442695, %v602_v8  ;;  %v1589_v10 = vpop.f32.mrb[11].mxu0 }
 0x663   :  { %1751 = vpow2.f32 %v1440_v9 }
 0x664   :  { %1753 = vtanh.f32 %v599_v6 }
 0x66d   :  { %v1752_v11 = vpop.eup %1751 }
 0x66e   :  { %v610_v12 = vadd.f32 1.0, %v1752_v11  ;;  %v1754_v13 = vpop.eup %1753  ;;  %v1460_v11 = vld [vmem:[%s2054_s4 + $0x10] sm:$0xf] }
 0x670   :  { %1755 = vrcp.f32 %v610_v12 }
 0x67a   :  { %v1756_v14 = vpop.eup %1755 }
 0x67b   :  { %v613_v15 = vmul.f32 %v1756_v14, %v1754_v13 }
 0x67d   :  { %v614_v16 = vpack.c.bf16 %v613_v15, %v613_v15 }
 0x67f   :  { %616 = vrot.lane.b32.xlu1 %v614_v16, %s1779_s12  ;;  %v669_v17 = vsel %vm63_vm1, %v614_v16, 0 }
 0x680   :  { %1597 = vmatpush3.bf16.msra.mxu1 %v669_v17 }
 0x681   :  { %1602 = vmatprep.subr.bf16.mxu1 %v1776_v2 }
 0x683   :  { %1599 = vmatmul.mubr.msk.bf16.vlgmr.msra.gmra.mrb[12].mxu1 %vm59_vm2, %v1434_v18 }
 0x684   :  { %1604 = vmatprep.mubr.msk.bf16.mxu1 %vm1777_vm0, %v1776_v2 }
 0x6f1   :  { %v617_v19 = vpop.permute.xlu1 %616 }
 0x6f2   :  { %v622_v20 = vsel %vm63_vm1, %v617_v19, 0 }
 0x6f3   :  { %1591 = vmatpush3.bf16.msra.mxu0 %v622_v20 }
 0x6f4   :  { %1614 = vmatprep.subr.bf16.mxu0 %v1776_v2 }
 0x6f6   :  { %1593 = vmatmul.mubr.msk.bf16.vlgmr.msra.gmra.mrb[4].mxu0 %vm59_vm2, %v1435_v40  ;;  %v1473_v40 = vld [vmem:[%s2055_s5 + $0x14] sm:$0xf] }
 0x6f7   :  { %1616 = vmatprep.mubr.msk.bf16.mxu0 %vm1777_vm0, %v1776_v2 }
 0x756   :  { %v705_v21 = vpop.f32.mrb[12].mxu1 }
 0x757   :  { %v711_v22 = vadd.f32 %v705_v21, %v487_v58  ;;  %v1600_v23 = vpop.f32.mrb[13].mxu1  ;;  %v1736_v21 = vld [vmem:[%s2051_s3 + $0x28] sm:$0xff]  }
 0x758   :  { %v708_v24 = vpop.f32.mrb[14].mxu1 }
 0x759   :  { %v725_v25 = vpack.c.bf16 %v711_v22, %v711_v22  ;;  %722 = vrot.lane.b32.xlu0 %v711_v22, %s1778_s1  ;;  %v1601_v26 = vpop.f32.mrb[15].mxu1 }
 0x75a   :  { %v1461_v26 = vld [vmem:[%s2055_s5 + $0x10] sm:$0xf] }
 0x75b   :  { %v735_v27 = vsel %vm63_vm1, %v725_v25, 0  ;;  %v1737_v25 = vld [vmem:[%s2052_s2 + $0x28] sm:$0xff]  }
 0x75c   :  { %1603 = vmatpush3.bf16.msra.mxu1 %v735_v27 }
 0x75d   :  { %1608 = vmatprep.subr.bf16.mxu1 %v1776_v2 }
 0x75f   :  { %1605 = vmatmul.mubr.msk.bf16.vlgmr.msra.gmra.mrb[16].mxu1 %vm59_vm2, %v1732_v28 }
 0x760   :  { %1610 = vmatprep.mubr.msk.bf16.mxu1 %vm1777_vm0, %v1776_v2 }
 0x7cb   :  { %v723_v29 = vpop.permute.xlu0 %722 }
 0x7cc   :  { %v724_v30 = vpack.c.bf16 %v723_v29, %v723_v29 }
 0x7ce   :  { %v787_v31 = vsel %vm63_vm1, %v724_v30, 0 }
 0x7cf   :  { %1609 = vmatpush3.bf16.msra.mxu1 %v787_v31 }
 0x7d0   :  { %1620 = vmatprep.subr.bf16.mxu1 %v1776_v2 }
 0x7d2   :  { %1611 = vmatmul.mubr.msk.bf16.vlgmr.msra.gmra.mrb[16].mxu1 %vm59_vm2, %v1733_v32 }
 0x7d3   :  { %1622 = vmatprep.mubr.msk.bf16.mxu1 %vm1777_vm0, %v1776_v2 }
 0x8a5   :  { %v823_v33 = vpop.f32.mrb[16].mxu1 }
 0x8a6   :  { %v1612_v34 = vpop.f32.mrb[17].mxu1 }
 0x8a7   :  { %v826_v35 = vpop.f32.mrb[18].mxu1 }
 0x8a8   :  { %v1453_v36 = vmul.f32 -1.442695, %v826_v35  ;;  %v1613_v37 = vpop.f32.mrb[19].mxu1 }
 0x8aa   :  { %1757 = vpow2.f32 %v1453_v36 }
 0x8ab   :  { %1759 = vtanh.f32 %v823_v33 }
 0x8b4   :  { %v1758_v38 = vpop.eup %1757 }
 0x8b5   :  { %v834_v39 = vadd.f32 1.0, %v1758_v38  ;;  %v1760_v41 = vpop.eup %1759 }
 0x8b7   :  { %1761 = vrcp.f32 %v834_v39 }
 0x8c1   :  { %v1762_v42 = vpop.eup %1761 }
 0x8c2   :  { %v837_v43 = vmul.f32 %v1762_v42, %v1760_v41  ;;  %v1339_v41 = vld [vmem:[%s2056_s7] sm:$0xff] }
 0x8c4   :  { %v838_v44 = vpack.c.bf16 %v837_v43, %v837_v43 }
 0x8c6   :  { %840 = vrot.lane.b32.xlu0 %v838_v44, %s1779_s12  ;;  %v893_v45 = vsel %vm63_vm1, %v838_v44, 0 }
 0x8c7   :  { %1621 = vmatpush3.bf16.msra.mxu1 %v893_v45 }
 0x8c8   :  { %1644 = vmatprep.subr.bf16.mxu1 %v1776_v2 }
 0x8ca   :  { %1623 = vmatmul.mubr.msk.bf16.vlgmr.msra.gmra.mrb[20].mxu1 %vm59_vm2, %v1447_v46 }
 0x8cb   :  { %1646 = vmatprep.mubr.msk.bf16.mxu1 %vm1777_vm0, %v1776_v2 }
 0x938   :  { %v841_v47 = vpop.permute.xlu0 %840 }
 0x939   :  { %v846_v48 = vsel %vm63_vm1, %v841_v47, 0 }
 0x93a   :  { %1615 = vmatpush3.bf16.msra.mxu0 %v846_v48 }
 0x93b   :  { %1626 = vmatprep.subr.bf16.mxu0 %v1776_v2 }
 0x93d   :  { %1617 = vmatmul.mubr.msk.bf16.vlgmr.msra.gmra.mrb[4].mxu0 %vm59_vm2, %v1448_v49  ;;  %v1738_v49 = vld [vmem:[%s2057_s6] sm:$0xff]  }
 0x93e   :  { %1628 = vmatprep.mubr.msk.bf16.mxu0 %vm1777_vm0, %v1776_v2 }
 0x99d   :  { %v929_v50 = vpop.f32.mrb[20].mxu1 }
 0x99e   :  { %v935_v51 = vadd.f32 %v929_v50, %v711_v22  ;;  %v1624_v52 = vpop.f32.mrb[21].mxu1 }
 0x99f   :  { %v932_v53 = vpop.f32.mrb[22].mxu1 }
 0x9a0   :  { %v949_v54 = vpack.c.bf16 %v935_v51, %v935_v51  ;;  %946 = vrot.lane.b32.xlu1 %v935_v51, %s1780_s15  ;;  %v1625_v55 = vpop.f32.mrb[23].mxu1 }
 0x9a2   :  { %v959_v56 = vsel %vm63_vm1, %v949_v54, 0 }
 0x9a3   :  { %1627 = vmatpush3.bf16.msra.mxu0 %v959_v56 }
 0x9a4   :  { %1632 = vmatprep.subr.bf16.mxu0 %v1776_v2 }
 0x9a6   :  { %1629 = vmatmul.mubr.msk.bf16.vlgmr.msra.gmra.mrb[12].mxu0 %vm59_vm2, %v1734_v57 }
 0x9a7   :  { %1634 = vmatprep.mubr.msk.bf16.mxu0 %vm1777_vm0, %v1776_v2 }
 0xa12   :  { %v947_v58 = vpop.permute.xlu1 %946 }
 0xa13   :  { %v948_v59 = vpack.c.bf16 %v947_v58, %v947_v58 }
 0xa15   :  { %v1011_v60 = vsel %vm63_vm1, %v948_v59, 0 }
 0xa16   :  { %1633 = vmatpush3.bf16.msra.mxu0 %v1011_v60 }
 0xa17   :  { %1638 = vmatprep.subr.bf16.mxu0 %v1776_v2 }
 0xa19   :  { %1635 = vmatmul.mubr.msk.bf16.vlgmr.msra.gmra.mrb[12].mxu0 %vm59_vm2, %v1735_v61 }
 0xa1a   :  { %1640 = vmatprep.mubr.msk.bf16.mxu0 %vm1777_vm0, %v1776_v2 }
 0xaec   :  { %v1047_v62 = vpop.f32.mrb[12].mxu0 }
 0xaed   :  { %v1636_v63 = vpop.f32.mrb[13].mxu0 }
 0xaee   :  { %v1050_v0 = vpop.f32.mrb[14].mxu0 }
 0xaef   :  { %v1466_v1 = vmul.f32 -1.442695, %v1050_v0  ;;  %v1637_v3 = vpop.f32.mrb[15].mxu0 }
 0xaf1   :  { %1763 = vpow2.f32 %v1466_v1 }
 0xaf2   :  { %1765 = vtanh.f32 %v1047_v62 }
 0xafb   :  { %v1764_v4 = vpop.eup %1763 }
 0xafc   :  { %v1058_v5 = vadd.f32 1.0, %v1764_v4  ;;  %v1766_v6 = vpop.eup %1765 }
 0xafe   :  { %1767 = vrcp.f32 %v1058_v5 }
 0xb08   :  { %v1768_v7 = vpop.eup %1767 }
 0xb09   :  { %v1061_v8 = vmul.f32 %v1768_v7, %v1766_v6 }
 0xb0b   :  { %v1062_v9 = vpack.c.bf16 %v1061_v8, %v1061_v8 }
 0xb0d   :  { %1064 = vrot.lane.b32.xlu1 %v1062_v9, %s1779_s12  ;;  %v1117_v10 = vsel %vm63_vm1, %v1062_v9, 0 }
 0xb0e   :  { %1645 = vmatpush3.bf16.msra.mxu1 %v1117_v10 }
 0xb0f   :  { %1650 = vmatprep.subr.bf16.mxu1 %v1776_v2 }
 0xb11   :  { %1647 = vmatmul.mubr.msk.bf16.vlgmr.msra.gmra.mrb[24].mxu1 %vm59_vm2, %v1460_v11  ;;  %1343 = vperm.xlu1 %1725, %v1339_v41  }
 0xb12   :  { %1652 = vmatprep.mubr.msk.bf16.mxu1 %vm1777_vm0, %v1776_v2 }
 0xb7f   :  { %v1065_v12 = vpop.permute.xlu1 %1064 }
 0xb80   :  { %v1070_v13 = vsel %vm63_vm1, %v1065_v12, 0 }
 0xb81   :  { %1639 = vmatpush3.bf16.msra.mxu0 %v1070_v13 }
 0xb82   :  { %1662 = vmatprep.subr.bf16.mxu0 %v1776_v2 }
 0xb84   :  { %1641 = vmatmul.mubr.msk.bf16.vlgmr.msra.gmra.mrb[4].mxu0 %vm59_vm2, %v1461_v26 }
 0xb85   :  { %1664 = vmatprep.mubr.msk.bf16.mxu0 %vm1777_vm0, %v1776_v2 }
 0xb90   :  { %v1344_v50 = vpop.permute.xlu1 %1343 }
 0xbe4   :  { %v1153_v14 = vpop.f32.mrb[24].mxu1 }
 0xbe5   :  { %v1159_v15 = vadd.f32 %v1153_v14, %v935_v51  ;;  %v1648_v16 = vpop.f32.mrb[25].mxu1 }
 0xbe6   :  { %v1156_v17 = vpop.f32.mrb[26].mxu1 }
 0xbe7   :  { %v1171_v18 = vpack.c.bf16 %v1159_v15, %v1159_v15  ;;  %1168 = vrot.lane.b32.xlu0 %v1159_v15, %s1779_s12  ;;  %v1649_v19 = vpop.f32.mrb[27].mxu1 }
 0xbe9   :  { %v1181_v20 = vsel %vm63_vm1, %v1171_v18, 0 }
 0xbea   :  { %1651 = vmatpush3.bf16.msra.mxu1 %v1181_v20 }
 0xbeb   :  { %1656 = vmatprep.subr.bf16.mxu1 %v1776_v2 }
 0xbed   :  { %1653 = vmatmul.mubr.msk.bf16.vlgmr.msra.gmra.mrb[28].mxu1 %vm59_vm2, %v1736_v21 }
 0xbee   :  { %1658 = vmatprep.mubr.msk.bf16.mxu1 %vm1777_vm0, %v1776_v2 }
 0xc59   :  { %v1169_v22 = vpop.permute.xlu0 %1168 }
 0xc5a   :  { %v1170_v23 = vpack.c.bf16 %v1169_v22, %v1169_v22 }
 0xc5c   :  { %v1233_v24 = vsel %vm63_vm1, %v1170_v23, 0 }
 0xc5d   :  { %1657 = vmatpush3.bf16.msra.mxu1 %v1233_v24 }
 0xc5e   :  { %1668 = vmatprep.subr.bf16.mxu1 %v1776_v2 }
 0xc60   :  { %1659 = vmatmul.mubr.msk.bf16.vlgmr.msra.gmra.mrb[28].mxu1 %vm59_vm2, %v1737_v25 }
 0xc61   :  { %1670 = vmatprep.mubr.msk.bf16.mxu1 %vm1777_vm0, %v1776_v2  ;;  %v1340_v2 = vld [vmem:[%s2056_s7 + $0x8] sm:$0xff] }
 0xd33   :  { %v1269_v27 = vpop.f32.mrb[28].mxu1 }
 0xd34   :  { %v1660_v28 = vpop.f32.mrb[29].mxu1 }
 0xd35   :  { %v1272_v29 = vpop.f32.mrb[30].mxu1 }
 0xd36   :  { %v1478_v30 = vmul.f32 -1.442695, %v1272_v29  ;;  %v1661_v31 = vpop.f32.mrb[31].mxu1 }
 0xd38   :  { %1769 = vpow2.f32 %v1478_v30 }
 0xd39   :  { %1771 = vtanh.f32 %v1269_v27 }
 0xd42   :  { %v1770_v32 = vpop.eup %1769 }
 0xd43   :  { %v1280_v33 = vadd.f32 1.0, %v1770_v32  ;;  %v1772_v34 = vpop.eup %1771 }
 0xd45   :  { %1773 = vrcp.f32 %v1280_v33 }
 0xd4f   :  { %v1774_v35 = vpop.eup %1773 }
 0xd50   :  { %v1283_v36 = vmul.f32 %v1774_v35, %v1772_v34 }
 0xd52   :  { %v1284_v37 = vpack.c.bf16 %v1283_v36, %v1283_v36 }
 0xd54   :  { %1286 = vrot.lane.b32.xlu0 %v1284_v37, %s1779_s12 }
 0xd58   :  { %1348 = vperm.xlu0 %1724, %v1340_v2  }
 0xdc6   :  { %v1287_v38 = vpop.permute.xlu0 %1286 }
 0xdc7   :  { %v1292_v39 = vsel %vm63_vm1, %v1287_v38, 0 }
 0xdc8   :  { %1663 = vmatpush3.bf16.msra.mxu0 %v1292_v39 }
 0xdcb   :  { %1665 = vmatmul.mubr.msk.bf16.vlgmr.msra.gmra.mrb[4].mxu0 %vm59_vm2, %v1473_v40 }
 0xdd7   :  { %v1349_v54 = vpop.permute.xlu0 %1348 }
 0xe9e   :  { %v1328_v42 = vpop.f32.mrb[4].mxu0 }
 0xe9f   :  { %v1337_v43 = vmax.f32 %v1328_v42, 0.0  ;;  %v1666_v44 = vpop.f32.mrb[5].mxu0 }
 0xea0   :  { %v1331_v45 = vpop.f32.mrb[6].mxu0 }
 0xea1   :  { %v1338_v46 = vpack.c.bf16 %v1337_v43, %v1337_v43  ;;  %v1667_v47 = vpop.f32.mrb[7].mxu0 }
 0xea3   :  { %v1360_v48 = vsel %vm63_vm1, %v1338_v46, 0 }
 0xea4   :  { %1669 = vmatpush3.bf16.msra.mxu1 %v1360_v48 }
 0xea7   :  { %1671 = vmatmul.mubr.msk.bf16.vlgmr.msra.gmra.mrb[32].mxu1 %vm59_vm2, %v1738_v49 }
 0xf7a   :  { %v1396_v51 = vpop.f32.mrb[32].mxu1 }
 0xf7b   :  { %v1672_v52 = vpop.f32.mrb[33].mxu1  ;;  %v1397_v53 = vadd.f32 %v1396_v51, %v1344_v50 }
 0xf7c   :  { %v1399_v55 = vpop.f32.mrb[34].mxu1 }
 0xf7d   :  { %v1400_v56 = vadd.f32 %v1399_v55, %v1349_v54  ;;  %1403 = vst.msk [vmem:[%s2058_s8] sm:$0xff] %vm59_vm2, %v1397_v53  ;;  %v1673_v57 = vpop.f32.mrb[35].mxu1 }
 0xf7f   :  { %1404 = vst.msk [vmem:[%s2058_s8 + $0x8] sm:$0xff] %vm59_vm2, %v1400_v56 }

</bundles_post_ra>
